<compile_context>
chip_gen: v5e
topology: v5e:2x2
jax: 0.10.0
libtpu: 0.0.40
codegen_flags: <defaults>
</compile_context>

<pallas_src>
import jax
import jax.numpy as jnp
from jax.experimental import pallas as pl
from jax.experimental.pallas import tpu as pltpu

EPS = 1e-5          # nn.BatchNorm1d default eps
NEG_SLOPE = 0.01    # nn.LeakyReLU default negative_slope
LANE = 128
SUBLANE = 8


def _round_up(x, m):
    return (x + m - 1) // m * m


# --------------------------------------------------------------------------------------
# Parameter construction (mirrors py_model.__init__ / init_weights)
# --------------------------------------------------------------------------------------
def init_params(key, dims):
    """weight ~ N(0, 1/sqrt(in_dim)); bias keeps PyTorch default U(-1/sqrt(in), 1/sqrt(in));
    BatchNorm gamma=1, beta=0. Returned in PyTorch [out, in] layout (used by the reference)."""
    params = []
    n_layers = len(dims) - 1
    for i in range(n_layers):
        key, kw, kb = jax.random.split(key, 3)
        in_d, out_d = dims[i], dims[i + 1]
        std = 1.0 / float(in_d) ** 0.5
        w_oi = std * jax.random.normal(kw, (out_d, in_d), dtype=jnp.float32)
        b = jax.random.uniform(kb, (out_d,), dtype=jnp.float32, minval=-std, maxval=std)
        if i < n_layers - 1:
            gamma = jnp.ones((out_d,), jnp.float32)
            beta = jnp.zeros((out_d,), jnp.float32)
            params.append(("hidden", w_oi, b, gamma, beta))
        else:
            params.append(("final", w_oi, b))
    return params


def pack_params(params, dims):
    """Pack everything the kernel needs into TWO zero-padded, lane-dense operands.

    Hidden-layer Linear biases are intentionally omitted: they cancel exactly under
    training-mode BatchNorm (mean subtraction removes them, variance is unaffected)."""
    n_layers = len(dims) - 1
    n_hidden = n_layers - 1
    P = _round_up(max(dims), LANE)
    vec_rows = _round_up(2 * n_hidden + 1, SUBLANE)

    w_all = jnp.zeros((n_layers, P, P), jnp.float32)
    vecs = jnp.zeros((vec_rows, P), jnp.float32)
    for l, layer in enumerate(params):
        w_oi = layer[1]                       # [out, in] (PyTorch layout)
        out_d, in_d = w_oi.shape
        w_all = w_all.at[l, :in_d, :out_d].set(w_oi.T)   # pre-transpose once -> [in, out]
        if layer[0] == "hidden":
            _, _, _b, gamma, beta = layer
            vecs = vecs.at[2 * l, :out_d].set(gamma)
            vecs = vecs.at[2 * l + 1, :out_d].set(beta)
        else:
            vecs = vecs.at[2 * n_hidden, :out_d].set(layer[2])   # final bias
    return w_all, vecs


# --------------------------------------------------------------------------------------
# Kernel
# --------------------------------------------------------------------------------------
def _fused_mlp_kernel(x_ref, w_ref, vec_ref, o_ref):
    """x_ref: (B, P) f32 (zero-padded lanes); w_ref: (n_layers, P, P); vec_ref: (R, P).
    Zero padding is self-consistent through the whole chain (padded lanes stay exactly 0)."""
    n_layers = w_ref.shape[0]
    n_hidden = n_layers - 1

    vecs = vec_ref[...]                     # one small lane-dense tile: all gammas/betas/bias
    x = x_ref[...]                          # (B, P) f32, already in VMEM

    for l in range(n_hidden):
        # Linear (MXU, f32 accumulate). Hidden bias omitted: cancels under train-mode BN.
        y = jnp.dot(x, w_ref[l], preferred_element_type=jnp.float32)
        # BatchNorm1d (training mode) folded into one affine.
        # Two independent axis-0 reductions (issued back-to-back on the XLU):
        mean = jnp.mean(y, axis=0, keepdims=True)
        mean_sq = jnp.mean(y * y, axis=0, keepdims=True)
        var = mean_sq - mean * mean
        gamma = vecs[2 * l:2 * l + 1, :]
        beta = vecs[2 * l + 1:2 * l + 2, :]
        scale = gamma * jax.lax.rsqrt(var + EPS)       # rsqrt -> EUP slot
        shift = beta - mean * scale
        z = y * scale + shift                          # 2 VALU ops per element
        # LeakyReLU: mul + max (2 VALU ops)
        x = jnp.maximum(z, NEG_SLOPE * z)

    # Final Linear (bias kept).
    b_last = vecs[2 * n_hidden:2 * n_hidden + 1, :]
    o_ref[...] = jnp.dot(x, w_ref[n_layers - 1], preferred_element_type=jnp.float32) + b_last


# --------------------------------------------------------------------------------------
# Wrappers
# --------------------------------------------------------------------------------------
def make_forward(dims):
    n_layers = len(dims) - 1
    n_hidden = n_layers - 1
    out_dim = dims[-1]
    P = _round_up(max(dims), LANE)

    @jax.jit
    def forward_stacked(x_stacked, w_all, vecs):
        """x_stacked: (N, B, d0) -> (N, B, out_dim). One BN instance per grid step."""
        N, B, d0 = x_stacked.shape
        if d0 != P:                                   # lane-dense, zero-padded input
            x_stacked = jnp.pad(x_stacked, ((0, 0), (0, 0), (0, P - d0)))
        vec_rows = vecs.shape[0]

        flops = 2 * N * B * P * P * n_layers + 12 * N * B * P * n_hidden
        bytes_accessed = 4 * (x_stacked.size + w_all.size + vecs.size + N * B * P)

        out = pl.pallas_call(
            _fused_mlp_kernel,
            out_shape=jax.ShapeDtypeStruct((N, B, P), jnp.float32),
            grid=(N,),
            in_specs=[
                pl.BlockSpec((None, B, P), lambda i: (i, 0, 0)),          # per-instance x
                pl.BlockSpec((n_layers, P, P), lambda i: (0, 0, 0)),      # shared weights
                pl.BlockSpec((vec_rows, P), lambda i: (0, 0)),            # shared vectors
            ],
            out_specs=pl.BlockSpec((None, B, P), lambda i: (i, 0, 0)),
            compiler_params=pltpu.CompilerParams(
                dimension_semantics=("parallel",),     # instances are independent (v7x: both TCs)
                vmem_limit_bytes=32 * 1024 * 1024,
            ),
            cost_estimate=pl.CostEstimate(
                flops=int(flops),
                transcendentals=int(N * P * n_hidden),
                bytes_accessed=int(bytes_accessed),
            ),
        )(x_stacked, w_all, vecs)
        return out[..., :out_dim]          # lane-dense (B,128) store in-kernel; slice outside

    def forward_single(x, w_all, vecs):
        """Matches py_model(x) in training mode for a single (B, d0) batch."""
        return forward_stacked(x[None], w_all, vecs)[0]

    return forward_single, forward_stacked


def reference_forward(x, params):
    """Pure-JAX reference with exact PyTorch semantics (hidden biases included)."""
    for layer in params:
        if layer[0] == "hidden":
            _, w_oi, b, gamma, beta = layer
            y = jnp.dot(x, w_oi.T, precision=jax.lax.Precision.HIGHEST) + b
            mean = jnp.mean(y, axis=0, keepdims=True)
            var = jnp.mean((y - mean) ** 2, axis=0, keepdims=True)
            z = gamma * (y - mean) * jax.lax.rsqrt(var + EPS) + beta
            x = jnp.where(z >= 0, z, NEG_SLOPE * z)
        else:
            _, w_oi, b = layer
            x = jnp.dot(x, w_oi.T, precision=jax.lax.Precision.HIGHEST) + b
    return x


# TODO(synk): nn.BatchNorm1d running_mean / running_var buffers (and their momentum update)
# are not tracked; this implements the training-mode forward pass only.

if __name__ == "__main__":
    dims = [32, 64, 48, 16]   # Linear->BN->LeakyReLU, Linear->BN->LeakyReLU, Linear
    batch = 8
    n_inst = 4                # independent mini-batches sharing weights (parallel grid axis)

    key = jax.random.PRNGKey(0)
    key, kx = jax.random.split(key)
    xs = jax.random.normal(kx, (n_inst, batch, dims[0]), dtype=jnp.float32)

    params = init_params(key, dims)
    w_all, vecs = pack_params(params, dims)
    fwd_single, fwd_stacked = make_forward(dims)

    # Single forward — matches py_model(x) in training mode.
    out1 = jax.block_until_ready(fwd_single(xs[0], w_all, vecs))
    assert out1.shape == (batch, dims[-1])
    ref1 = reference_forward(xs[0], params)
    assert jnp.allclose(out1, ref1, rtol=1e-2, atol=1e-2), "single-forward mismatch vs reference"

    # Stacked independent forwards under a 'parallel' grid axis.
    outs = jax.block_until_ready(fwd_stacked(xs, w_all, vecs))
    assert outs.shape == (n_inst, batch, dims[-1])
    for i in range(n_inst):
        refi = reference_forward(xs[i], params)
        assert jnp.allclose(outs[i], refi, rtol=1e-2, atol=1e-2), f"instance {i} mismatch"

    print("KERNEL_OK")
</pallas_src>

<mosaic_0001>
module attributes {stable_mosaic.version = 11 : i64} {
  func.func @_fused_mlp_kernel(%arg0: i32, %arg1: memref<1x8x128xf32, #tpu.memory_space<vmem>>, %arg2: memref<3x128x128xf32, #tpu.memory_space<vmem>>, %arg3: memref<8x128xf32, #tpu.memory_space<vmem>>, %arg4: memref<1x8x128xf32, #tpu.memory_space<vmem>>) attributes {dimension_semantics = [#tpu.dimension_semantics<parallel>], iteration_bounds = array<i64: 1>, scalar_prefetch = 0 : i64, scratch_operands = 0 : i64, tpu.core_type = #tpu.core_type<tc>, window_params = [{transform_indices = @transform_0, window_bounds = array<i64: 1, 8, 128>}, {pipeline_mode = #tpu.pipeline_mode<synchronous>, transform_indices = @transform_1, window_bounds = array<i64: 3, 128, 128>}, {pipeline_mode = #tpu.pipeline_mode<synchronous>, transform_indices = @transform_2, window_bounds = array<i64: 8, 128>}, {transform_indices = @transform_3, window_bounds = array<i64: 1, 8, 128>}]} {
    %c0 = arith.constant 0 : index
    %c0_0 = arith.constant 0 : index
    %0 = vector.load %arg3[%c0, %c0_0] : memref<8x128xf32, #tpu.memory_space<vmem>>, vector<8x128xf32>
    %c0_1 = arith.constant 0 : index
    %c0_2 = arith.constant 0 : index
    %c0_3 = arith.constant 0 : index
    %1 = vector.load %arg1[%c0_1, %c0_2, %c0_3] : memref<1x8x128xf32, #tpu.memory_space<vmem>>, vector<1x8x128xf32>
    %2 = vector.shape_cast %1 : vector<1x8x128xf32> to vector<8x128xf32>
    %c0_4 = arith.constant 0 : index
    %c0_5 = arith.constant 0 : index
    %c0_6 = arith.constant 0 : index
    %3 = vector.load %arg2[%c0_4, %c0_5, %c0_6] : memref<3x128x128xf32, #tpu.memory_space<vmem>>, vector<1x128x128xf32>
    %4 = vector.shape_cast %3 : vector<1x128x128xf32> to vector<128x128xf32>
    %cst = arith.constant dense<0.000000e+00> : vector<8x128xf32>
    %5 = tpu.matmul %2, %4, %cst {dimension_numbers = #tpu.dot_dimension_numbers<[1], [0], [0], [1], [0, 0, 1, 1], [], []>} : vector<8x128xf32>, vector<128x128xf32>, vector<8x128xf32> -> vector<8x128xf32>
    %cst_7 = arith.constant dense<0.000000e+00> : vector<128xf32>
    %6 = vector.multi_reduction <add>, %5, %cst_7 [0] : vector<8x128xf32> to vector<128xf32>
    %7 = vector.shape_cast %6 : vector<128xf32> to vector<1x128xf32>
    %cst_8 = arith.constant 8.000000e+00 : f32
    %8 = vector.broadcast %cst_8 : f32 to vector<1x128xf32>
    %9 = arith.divf %7, %8 : vector<1x128xf32>
    %10 = arith.mulf %5, %5 : vector<8x128xf32>
    %cst_9 = arith.constant dense<0.000000e+00> : vector<128xf32>
    %11 = vector.multi_reduction <add>, %10, %cst_9 [0] : vector<8x128xf32> to vector<128xf32>
    %12 = vector.shape_cast %11 : vector<128xf32> to vector<1x128xf32>
    %cst_10 = arith.constant 8.000000e+00 : f32
    %13 = vector.broadcast %cst_10 : f32 to vector<1x128xf32>
    %14 = arith.divf %12, %13 : vector<1x128xf32>
    %15 = arith.mulf %9, %9 : vector<1x128xf32>
    %16 = arith.subf %14, %15 : vector<1x128xf32>
    %17 = vector.extract_strided_slice %0 {offsets = [0, 0], sizes = [1, 128], strides = [1, 1]} : vector<8x128xf32> to vector<1x128xf32>
    %18 = vector.extract_strided_slice %0 {offsets = [1, 0], sizes = [1, 128], strides = [1, 1]} : vector<8x128xf32> to vector<1x128xf32>
    %cst_11 = arith.constant 9.99999974E-6 : f32
    %19 = vector.broadcast %cst_11 : f32 to vector<1x128xf32>
    %20 = arith.addf %16, %19 : vector<1x128xf32>
    %21 = math.rsqrt %20 : vector<1x128xf32>
    %22 = arith.mulf %17, %21 : vector<1x128xf32>
    %23 = arith.mulf %9, %22 : vector<1x128xf32>
    %24 = arith.subf %18, %23 : vector<1x128xf32>
    %25 = vector.broadcast %22 : vector<1x128xf32> to vector<8x128xf32>
    %26 = arith.mulf %5, %25 : vector<8x128xf32>
    %27 = vector.broadcast %24 : vector<1x128xf32> to vector<8x128xf32>
    %28 = arith.addf %26, %27 : vector<8x128xf32>
    %cst_12 = arith.constant 0.00999999977 : f32
    %29 = vector.broadcast %cst_12 : f32 to vector<8x128xf32>
    %30 = arith.mulf %29, %28 : vector<8x128xf32>
    %31 = arith.maximumf %28, %30 : vector<8x128xf32>
    %c1 = arith.constant 1 : index
    %c0_13 = arith.constant 0 : index
    %c0_14 = arith.constant 0 : index
    %32 = vector.load %arg2[%c1, %c0_13, %c0_14] : memref<3x128x128xf32, #tpu.memory_space<vmem>>, vector<1x128x128xf32>
    %33 = vector.shape_cast %32 : vector<1x128x128xf32> to vector<128x128xf32>
    %cst_15 = arith.constant dense<0.000000e+00> : vector<8x128xf32>
    %34 = tpu.matmul %31, %33, %cst_15 {dimension_numbers = #tpu.dot_dimension_numbers<[1], [0], [0], [1], [0, 0, 1, 1], [], []>} : vector<8x128xf32>, vector<128x128xf32>, vector<8x128xf32> -> vector<8x128xf32>
    %cst_16 = arith.constant dense<0.000000e+00> : vector<128xf32>
    %35 = vector.multi_reduction <add>, %34, %cst_16 [0] : vector<8x128xf32> to vector<128xf32>
    %36 = vector.shape_cast %35 : vector<128xf32> to vector<1x128xf32>
    %cst_17 = arith.constant 8.000000e+00 : f32
    %37 = vector.broadcast %cst_17 : f32 to vector<1x128xf32>
    %38 = arith.divf %36, %37 : vector<1x128xf32>
    %39 = arith.mulf %34, %34 : vector<8x128xf32>
    %cst_18 = arith.constant dense<0.000000e+00> : vector<128xf32>
    %40 = vector.multi_reduction <add>, %39, %cst_18 [0] : vector<8x128xf32> to vector<128xf32>
    %41 = vector.shape_cast %40 : vector<128xf32> to vector<1x128xf32>
    %cst_19 = arith.constant 8.000000e+00 : f32
    %42 = vector.broadcast %cst_19 : f32 to vector<1x128xf32>
    %43 = arith.divf %41, %42 : vector<1x128xf32>
    %44 = arith.mulf %38, %38 : vector<1x128xf32>
    %45 = arith.subf %43, %44 : vector<1x128xf32>
    %46 = vector.extract_strided_slice %0 {offsets = [2, 0], sizes = [1, 128], strides = [1, 1]} : vector<8x128xf32> to vector<1x128xf32>
    %47 = vector.extract_strided_slice %0 {offsets = [3, 0], sizes = [1, 128], strides = [1, 1]} : vector<8x128xf32> to vector<1x128xf32>
    %cst_20 = arith.constant 9.99999974E-6 : f32
    %48 = vector.broadcast %cst_20 : f32 to vector<1x128xf32>
    %49 = arith.addf %45, %48 : vector<1x128xf32>
    %50 = math.rsqrt %49 : vector<1x128xf32>
    %51 = arith.mulf %46, %50 : vector<1x128xf32>
    %52 = arith.mulf %38, %51 : vector<1x128xf32>
    %53 = arith.subf %47, %52 : vector<1x128xf32>
    %54 = vector.broadcast %51 : vector<1x128xf32> to vector<8x128xf32>
    %55 = arith.mulf %34, %54 : vector<8x128xf32>
    %56 = vector.broadcast %53 : vector<1x128xf32> to vector<8x128xf32>
    %57 = arith.addf %55, %56 : vector<8x128xf32>
    %cst_21 = arith.constant 0.00999999977 : f32
    %58 = vector.broadcast %cst_21 : f32 to vector<8x128xf32>
    %59 = arith.mulf %58, %57 : vector<8x128xf32>
    %60 = arith.maximumf %57, %59 : vector<8x128xf32>
    %61 = vector.extract_strided_slice %0 {offsets = [4, 0], sizes = [1, 128], strides = [1, 1]} : vector<8x128xf32> to vector<1x128xf32>
    %c2 = arith.constant 2 : index
    %c0_22 = arith.constant 0 : index
    %c0_23 = arith.constant 0 : index
    %62 = vector.load %arg2[%c2, %c0_22, %c0_23] : memref<3x128x128xf32, #tpu.memory_space<vmem>>, vector<1x128x128xf32>
    %63 = vector.shape_cast %62 : vector<1x128x128xf32> to vector<128x128xf32>
    %cst_24 = arith.constant dense<0.000000e+00> : vector<8x128xf32>
    %64 = tpu.matmul %60, %63, %cst_24 {dimension_numbers = #tpu.dot_dimension_numbers<[1], [0], [0], [1], [0, 0, 1, 1], [], []>} : vector<8x128xf32>, vector<128x128xf32>, vector<8x128xf32> -> vector<8x128xf32>
    %65 = vector.broadcast %61 : vector<1x128xf32> to vector<8x128xf32>
    %66 = arith.addf %64, %65 : vector<8x128xf32>
    %c0_25 = arith.constant 0 : index
    %c0_26 = arith.constant 0 : index
    %c0_27 = arith.constant 0 : index
    %67 = vector.load %arg4[%c0_25, %c0_26, %c0_27] : memref<1x8x128xf32, #tpu.memory_space<vmem>>, vector<1x8x128xf32>
    %68 = vector.shape_cast %67 : vector<1x8x128xf32> to vector<8x128xf32>
    %69 = vector.shape_cast %66 : vector<8x128xf32> to vector<1x8x128xf32>
    tpu.vector_store %arg4[%c0_25, %c0_26, %c0_27], %69 {strides = array<i32>} : memref<1x8x128xf32, #tpu.memory_space<vmem>>, vector<1x8x128xf32>,
    return
  }
  func.func @transform_0(%arg0: i32) -> (i32, i32, i32) {
    %c0_i32 = arith.constant 0 : i32
    %c0_i32_0 = arith.constant 0 : i32
    %c0_i32_1 = arith.constant 0 : i32
    return %arg0, %c0_i32, %c0_i32_0 : i32, i32, i32
  }
  func.func @transform_1(%arg0: i32) -> (i32, i32, i32) {
    %c0_i32 = arith.constant 0 : i32
    %c0_i32_0 = arith.constant 0 : i32
    %c0_i32_1 = arith.constant 0 : i32
    %c0_i32_2 = arith.constant 0 : i32
    return %c0_i32, %c0_i32_0, %c0_i32_1 : i32, i32, i32
  }
  func.func @transform_2(%arg0: i32) -> (i32, i32) {
    %c0_i32 = arith.constant 0 : i32
    %c0_i32_0 = arith.constant 0 : i32
    %c0_i32_1 = arith.constant 0 : i32
    return %c0_i32, %c0_i32_0 : i32, i32
  }
  func.func @transform_3(%arg0: i32) -> (i32, i32, i32) {
    %c0_i32 = arith.constant 0 : i32
    %c0_i32_0 = arith.constant 0 : i32
    %c0_i32_1 = arith.constant 0 : i32
    return %arg0, %c0_i32, %c0_i32_0 : i32, i32, i32
  }
}

</mosaic_0001>

<bundles_post_ra>
// kernel: forward_stacked.1
= control target key start
LH: loop header
LB: loop body
LE: loop exit
PB: predicated region body
PF: predicated region fallthrough
CT: control target
= control target key end

     0   :  { %8 = vsyncpa [#allocation3], 0  ;;  %s369_s0 = inlined_call_operand.vmem [shape: f32[1,8,128], index: 0, kind: input, shape index: {}]   ;;  %s370_s1 = inlined_call_operand.hbm [shape: f32[3,128,128], index: 1, kind: input, shape index: {}]   ;;  %s371_s2 = inlined_call_operand.vmem [shape: f32[8,128], index: 2, kind: input, shape index: {}]   ;;  %s372_s3 = inlined_call_operand.hbm [shape: f32[1,8,128], index: 3, kind: output, shape index: {}]  }
   0x1   :  { %9 = vsyncpa [#allocation4], 0  ;;  %s16_s14 = sshll.u32 %s370_s1, 4  ;;  %s312_s15 = smov [#allocation2]   ;;  %s17_s14 = int_to_ptr.hbm [resolvable:$true] %s16_s14 }
   0x2   :  { %s18_s16 = sshll.u32 %s312_s15, 4  ;;  %s313_s17 = smov 128   ;;  %s19_s16 = int_to_ptr.vmem [resolvable:$true] %s18_s16 }
   0x3   :  { %s314_s18 = smov 8  }
   0x4   :  { %24 = dma.hbm_to_vmem [thread:$0]  %s17_s14, 6144, %s19_s16, [#allocation3], %s313_s17, %s313_s17, %s314_s18  }
   0x5   :  { %308 = dma.done.wait [#allocation3], 6144  }
   0x6   :  { %309 = vsyncadd [#allocation3], 4294961152  ;;  %v48_v0 = vld [vmem:[#allocation2 + $0x78] sm:$0xff]  ;;  %v47_v1 = vld [vmem:[#allocation2 + $0x70] sm:$0xff]  ;;  %v315_v17 = vmov 8.0   ;;  %s239_s24 = sshll.u32 %s372_s3, 4  ;;  %s240_s24 = int_to_ptr.hbm [resolvable:$true] %s239_s24 }
   0x7   :  { %49 = vmatpush.msra.mxu0 %v48_v0  ;;  %v46_v2 = vld [vmem:[#allocation2 + $0x68] sm:$0xff]  ;;  %v45_v3 = vld [vmem:[#allocation2 + $0x60] sm:$0xff]  ;;  %v44_v4 = vld [vmem:[#allocation2 + $0x58] sm:$0xff]  ;;  %254 = vrcp.f32 %v315_v17 }
   0x8   :  { %v43_v5 = vld [vmem:[#allocation2 + $0x50] sm:$0xff]  ;;  %v42_v6 = vld [vmem:[#allocation2 + $0x48] sm:$0xff]  ;;  %v41_v7 = vld [vmem:[#allocation2 + $0x40] sm:$0xff] }
   0x9   :  { %50 = vmatpush.msra.mxu0 %v47_v1  ;;  %v40_v8 = vld [vmem:[#allocation2 + $0x38] sm:$0xff]  ;;  %v39_v9 = vld [vmem:[#allocation2 + $0x30] sm:$0xff]  ;;  %v38_v10 = vld [vmem:[#allocation2 + $0x28] sm:$0xff] }
   0xa   :  { %v37_v11 = vld [vmem:[#allocation2 + $0x20] sm:$0xff]  ;;  %v36_v12 = vld [vmem:[#allocation2 + $0x18] sm:$0xff]  ;;  %v35_v13 = vld [vmem:[#allocation2 + $0x10] sm:$0xff] }
   0xb   :  { %51 = vmatpush.msra.mxu0 %v46_v2  ;;  %v34_v14 = vld [vmem:[#allocation2 + $0x8] sm:$0xff]  ;;  %v33_v15 = vld [vmem:[#allocation2] sm:$0xff]  ;;  %v132_v19 = vld [vmem:[#allocation2 + $0xf8] sm:$0xff] }
   0xc   :  { %v32_v16 = vld [vmem:[%s369_s0] sm:$0xff]  ;;  %133 = vmatpush.msra.mxu1 %v132_v19  ;;  %v131_v20 = vld [vmem:[#allocation2 + $0xf0] sm:$0xff]  ;;  %v130_v22 = vld [vmem:[#allocation2 + $0xe8] sm:$0xff] }
   0xd   :  { %52 = vmatpush.msra.mxu0 %v45_v3  ;;  %v255_v18 = vpop.eup %254  ;;  %v129_v23 = vld [vmem:[#allocation2 + $0xe0] sm:$0xff]  ;;  %v128_v25 = vld [vmem:[#allocation2 + $0xd8] sm:$0xff]  ;;  %v127_v29 = vld [vmem:[#allocation2 + $0xd0] sm:$0xff] }
   0xe   :  { %v76_v21 = vmul.f32 8.0, %v255_v18  ;;  %134 = vmatpush.msra.mxu1 %v131_v20  ;;  %v126_v33 = vld [vmem:[#allocation2 + $0xc8] sm:$0xff]  ;;  %v125_v36 = vld [vmem:[#allocation2 + $0xc0] sm:$0xff]  ;;  %vm80_vm0 = vweird.f32 %v255_v18  ;;  %v124_v40 = vld [vmem:[#allocation2 + $0xb8] sm:$0xff] }
   0xf   :  { %53 = vmatpush.msra.mxu0 %v44_v4  ;;  %v123_v43 = vld [vmem:[#allocation2 + $0xb0] sm:$0xff]  ;;  %v122_v47 = vld [vmem:[#allocation2 + $0xa8] sm:$0xff]  ;;  %v121_v48 = vld [vmem:[#allocation2 + $0xa0] sm:$0xff] }
  0x10   :  { %135 = vmatpush.msra.mxu1 %v130_v22  ;;  %v77_v24 = vsub.f32 1.0, %v76_v21  ;;  %v120_v51 = vld [vmem:[#allocation2 + $0x98] sm:$0xff]  ;;  %v119_v54 = vld [vmem:[#allocation2 + $0x90] sm:$0xff]  ;;  %v118_v56 = vld [vmem:[#allocation2 + $0x88] sm:$0xff] }
  0x11   :  { %54 = vmatpush.msra.mxu0 %v43_v5  ;;  %v117_v58 = vld [vmem:[#allocation2 + $0x80] sm:$0xff]  ;;  %v205_v17 = vld [vmem:[#allocation2 + $0x158] sm:$0xff]  ;;  %v204_v21 = vld [vmem:[#allocation2 + $0x150] sm:$0xff] }
  0x12   :  { %136 = vmatpush.msra.mxu1 %v129_v23  ;;  %v78_v30 = vmul.f32 %v255_v18, %v77_v24  ;;  %v356_v0 = vld [vmem:[%s371_s2] sm:$0xff]  ;;  %v203_v24 = vld [vmem:[#allocation2 + $0x148] sm:$0xff]  ;;  %s316_s2 = smov [#allocation5]  }
  0x13   :  { %55 = vmatpush.msra.mxu0 %v42_v6  ;;  %s237_s21 = sshll.u32 %s316_s2, 4  ;;  %s238_s21 = int_to_ptr.vmem [resolvable:$true] %s237_s21 }
  0x14   :  { %137 = vmatpush.msra.mxu1 %v128_v25  ;;  %v79_v37 = vadd.f32 %v255_v18, %v78_v30  ;;  %v201_v30 = vld [vmem:[#allocation2 + $0x138] sm:$0xff] }
  0x15   :  { %56 = vmatpush.msra.mxu0 %v41_v7 }
  0x16   :  { %138 = vmatpush.msra.mxu1 %v127_v29  ;;  %v349_v44 = vsel %vm80_vm0, %v255_v18, %v79_v37  ;;  %v198_v37 = vld [vmem:[#allocation2 + $0x120] sm:$0xff] }
  0x17   :  { %57 = vmatpush.msra.mxu0 %v40_v8 }
  0x18   :  { %139 = vmatpush.msra.mxu1 %v126_v33  ;;  %v200_v33 = vld [vmem:[#allocation2 + $0x130] sm:$0xff] }
  0x19   :  { %58 = vmatpush.msra.mxu0 %v39_v9 }
  0x1a   :  { %140 = vmatpush.msra.mxu1 %v125_v36  ;;  %v199_v36 = vld [vmem:[#allocation2 + $0x128] sm:$0xff] }
  0x1b   :  { %59 = vmatpush.msra.mxu0 %v38_v10 }
  0x1c   :  { %141 = vmatpush.msra.mxu1 %v124_v40  ;;  %v197_v40 = vld [vmem:[#allocation2 + $0x118] sm:$0xff] }
  0x1d   :  { %60 = vmatpush.msra.mxu0 %v37_v11 }
  0x1e   :  { %142 = vmatpush.msra.mxu1 %v123_v43  ;;  %v196_v43 = vld [vmem:[#allocation2 + $0x110] sm:$0xff] }
  0x1f   :  { %61 = vmatpush.msra.mxu0 %v36_v12 }
  0x20   :  { %143 = vmatpush.msra.mxu1 %v122_v47 }
  0x21   :  { %62 = vmatpush.msra.mxu0 %v35_v13  ;;  %v209_v13 = vld [vmem:[#allocation2 + $0x178] sm:$0xff] }
  0x22   :  { %144 = vmatpush.msra.mxu1 %v121_v48  ;;  %211 = vmatpush.msra.mxu2 %v209_v13  ;;  %v194_v48 = vld [vmem:[#allocation2 + $0x100] sm:$0xff] }
  0x23   :  { %63 = vmatpush.msra.mxu0 %v34_v14  ;;  %v208_v14 = vld [vmem:[#allocation2 + $0x170] sm:$0xff] }
  0x24   :  { %145 = vmatpush.msra.mxu1 %v120_v51  ;;  %212 = vmatpush.msra.mxu2 %v208_v14 }
  0x25   :  { %64 = vmatpush.msra.mxu0 %v33_v15  ;;  %v207_v15 = vld [vmem:[#allocation2 + $0x168] sm:$0xff] }
  0x26   :  { %65 = vmatmul.f32.vlgmr.msra.gmra.mxu0 %v32_v16  ;;  %146 = vmatpush.msra.mxu1 %v119_v54  ;;  %v206_v16 = vld [vmem:[#allocation2 + $0x160] sm:$0xff] }
  0x27   :  { %213 = vmatpush.msra.mxu2 %v207_v15 }
  0x28   :  { %147 = vmatpush.msra.mxu1 %v118_v56 }
  0x29   :  { %214 = vmatpush.msra.mxu2 %v206_v16 }
  0x2a   :  { %148 = vmatpush.msra.mxu1 %v117_v58 }
  0x2b   :  { %215 = vmatpush.msra.mxu2 %v205_v17 }
  0x2d   :  { %216 = vmatpush.msra.mxu2 %v204_v21 }
  0x2f   :  { %217 = vmatpush.msra.mxu2 %v203_v24 }
  0xa3   :  { %v343_v26 = vpop.f32.mrf.mxu0 }
  0xa4   :  { %v69_v27 = vrot.slane %v343_v26, 4  ;;  %v83_v28 = vmul.f32 %v343_v26, %v343_v26 }
  0xa6   :  { %v70_v31 = vadd.f32 %v69_v27, %v343_v26  ;;  %v84_v32 = vrot.slane %v83_v28, 4  ;;  %v202_v27 = vld [vmem:[#allocation2 + $0x140] sm:$0xff] }
  0xa7   :  { %218 = vmatpush.msra.mxu2 %v202_v27 }
  0xa8   :  { %v71_v34 = vrot.slane %v70_v31, 2  ;;  %v85_v35 = vadd.f32 %v84_v32, %v83_v28 }
  0xa9   :  { %219 = vmatpush.msra.mxu2 %v201_v30 }
  0xaa   :  { %v72_v38 = vadd.f32 %v71_v34, %v70_v31  ;;  %v86_v39 = vrot.slane %v85_v35, 2 }
  0xab   :  { %220 = vmatpush.msra.mxu2 %v200_v33 }
  0xac   :  { %v73_v41 = vrot.slane %v72_v38, 1  ;;  %v87_v42 = vadd.f32 %v86_v39, %v85_v35 }
  0xad   :  { %221 = vmatpush.msra.mxu2 %v199_v36 }
  0xae   :  { %v74_v45 = vadd.f32 %v73_v41, %v72_v38  ;;  %v88_v46 = vrot.slane %v87_v42, 1 }
  0xaf   :  { %222 = vmatpush.msra.mxu2 %v198_v37 }
  0xb0   :  { %v82_v49 = vmul.f32 %v349_v44, %v74_v45  ;;  %v89_v50 = vadd.f32 %v88_v46, %v87_v42  ;;  %v195_v46 = vld [vmem:[#allocation2 + $0x108] sm:$0xff] }
  0xb1   :  { %223 = vmatpush.msra.mxu2 %v197_v40 }
  0xb2   :  { %v90_v52 = vmul.f32 %v89_v50, %v349_v44  ;;  %v91_v53 = vmul.f32 %v82_v49, %v82_v49 }
  0xb3   :  { %224 = vmatpush.msra.mxu2 %v196_v43 }
  0xb4   :  { %v92_v55 = vsub.f32 %v90_v52, %v91_v53 }
  0xb5   :  { %225 = vmatpush.msra.mxu2 %v195_v46 }
  0xb6   :  { %v93_v57 = vadd.f32 1e-05, %v92_v55 }
  0xb7   :  { %226 = vmatpush.msra.mxu2 %v194_v48 }
  0xb8   :  { %256 = vrsqrt.f32 %v93_v57  ;;  %vm100_vm2 = vweird.f32 %v93_v57 }
  0xbe   :  { %v257_v59 = vpop.eup %256 }
  0xbf   :  { %v95_v60 = vmul.f32 %v257_v59, %v93_v57  ;;  %vm101_vm1 = vweird.f32 %v257_v59 }
  0xc0   :  { %vm102_vm3 = vmor %vm100_vm2, %vm101_vm1 }
  0xc1   :  { %v96_v61 = vmul.f32 %v257_v59, %v95_v60 }
  0xc3   :  { %v97_v62 = vmul.f32 0.5, %v96_v61 }
  0xc5   :  { %v98_v63 = vsub.f32 1.5, %v97_v62 }
  0xc7   :  { %v99_v1 = vmul.f32 %v257_v59, %v98_v63 }
  0xc9   :  { %v103_v2 = vsel %vm102_vm3, %v257_v59, %v99_v1 }
  0xca   :  { %v104_v3 = vmul.f32 %v103_v2, %v356_v0  ;;  %v210_v2 = vperm.slane %v356_v0, 4 }
  0xcc   :  { %v105_v4 = vmul.f32 %v104_v3, %v82_v49  ;;  %v110_v5 = vperm.slane %v104_v3, 0 }
  0xce   :  { %v107_v6 = vrot.slane %v105_v4, 7  ;;  %v111_v8 = vmul.f32 %v110_v5, %v343_v26 }
  0xd0   :  { %v109_v7 = vsub.f32 %v356_v0, %v107_v6 }
  0xd2   :  { %v112_v9 = vperm.slane %v109_v7, 1 }
  0xd4   :  { %v113_v10 = vadd.f32 %v112_v9, %v111_v8 }
  0xd6   :  { %v114_v11 = vmul.f32 0.01, %v113_v10 }
  0xd8   :  { %v115_v12 = vmax.f32 %v113_v10, %v114_v11 }
  0xda   :  { %149 = vmatmul.f32.vlgmr.msra.gmra.mxu1 %v115_v12 }
 0x157   :  { %v150_v18 = vpop.f32.mrf.mxu1 }
 0x158   :  { %v153_v19 = vrot.slane %v150_v18, 4  ;;  %v160_v20 = vmul.f32 %v150_v18, %v150_v18 }
 0x15a   :  { %v154_v22 = vadd.f32 %v153_v19, %v150_v18  ;;  %v161_v23 = vrot.slane %v160_v20, 4 }
 0x15c   :  { %v155_v25 = vrot.slane %v154_v22, 2  ;;  %v162_v26 = vadd.f32 %v161_v23, %v160_v20 }
 0x15e   :  { %v156_v28 = vadd.f32 %v155_v25, %v154_v22  ;;  %v163_v29 = vrot.slane %v162_v26, 2 }
 0x160   :  { %v157_v31 = vrot.slane %v156_v28, 1  ;;  %v164_v32 = vadd.f32 %v163_v29, %v162_v26 }
 0x162   :  { %v158_v34 = vadd.f32 %v157_v31, %v156_v28  ;;  %v165_v35 = vrot.slane %v164_v32, 1 }
 0x164   :  { %v159_v38 = vmul.f32 %v158_v34, %v349_v44  ;;  %v166_v39 = vadd.f32 %v165_v35, %v164_v32 }
 0x166   :  { %v167_v41 = vmul.f32 %v166_v39, %v349_v44  ;;  %v168_v42 = vmul.f32 %v159_v38, %v159_v38 }
 0x168   :  { %v169_v45 = vsub.f32 %v167_v41, %v168_v42 }
 0x16a   :  { %v170_v47 = vadd.f32 1e-05, %v169_v45 }
 0x16c   :  { %258 = vrsqrt.f32 %v170_v47  ;;  %vm177_vm5 = vweird.f32 %v170_v47 }
 0x172   :  { %v259_v49 = vpop.eup %258 }
 0x173   :  { %v172_v50 = vmul.f32 %v259_v49, %v170_v47  ;;  %vm178_vm4 = vweird.f32 %v259_v49 }
 0x174   :  { %vm179_vm6 = vmor %vm177_vm5, %vm178_vm4 }
 0x175   :  { %v173_v51 = vmul.f32 %v259_v49, %v172_v50 }
 0x177   :  { %v174_v52 = vmul.f32 0.5, %v173_v51 }
 0x179   :  { %v175_v53 = vsub.f32 1.5, %v174_v52 }
 0x17b   :  { %v176_v54 = vmul.f32 %v259_v49, %v175_v53 }
 0x17d   :  { %v180_v44 = vsel %vm179_vm6, %v259_v49, %v176_v54 }
 0x17e   :  { %v181_v55 = vmul.f32 %v180_v44, %v356_v0 }
 0x180   :  { %v182_v56 = vmul.f32 %v181_v55, %v159_v38  ;;  %v187_v57 = vperm.slane %v181_v55, 2 }
 0x182   :  { %v184_v58 = vrot.slane %v182_v56, 7  ;;  %v188_v60 = vmul.f32 %v187_v57, %v150_v18 }
 0x184   :  { %v186_v59 = vsub.f32 %v356_v0, %v184_v58 }
 0x186   :  { %v189_v61 = vperm.slane %v186_v59, 3 }
 0x188   :  { %v190_v62 = vadd.f32 %v189_v61, %v188_v60 }
 0x18a   :  { %v191_v63 = vmul.f32 0.01, %v190_v62 }
 0x18c   :  { %v192_v1 = vmax.f32 %v190_v62, %v191_v63 }
 0x18e   :  { %227 = vmatmul.f32.vlgmr.msra.gmra.mxu2 %v192_v1 }
 0x211   :  { %v228_v3 = vpop.f32.mrf.mxu2 }
 0x212   :  { %v229_v4 = vadd.f32 %v228_v3, %v210_v2 }
 0x214   :  { %231 = vst [vmem:[#allocation5] sm:$0xff] %v229_v4 }
 0x215   :  { %242 = dma.vmem_to_hbm [thread:$0]  %s238_s21, 128, %s240_s24, [#allocation4]  }
 0x216   :  { %310 = dma.done.wait [#allocation4], 128  }
 0x217   :  { %311 = vsyncadd [#allocation4], 4294967168 }
 0x218   :  { %247 = vsyncpa [#allocation3], 1 }
 0x219   :  { %248 = vsyncpa [#allocation4], 1 }

</bundles_post_ra>
